<compile_context>
chip_gen: v6e
topology: v6e:2x2x1
jax: 0.10.0
libtpu: 0.0.40
codegen_flags: <defaults>
</compile_context>

<pallas_src>
import jax
import jax.numpy as jnp
from jax.experimental import pallas as pl
from jax.experimental.pallas import tpu as pltpu

EPS = 1e-5
TILE_N = 512  # lane chunk for the tap matmuls (multiple of 128)


def _make_kernel(C, H, W):
    N = H * W

    def kernel(x_ref, w1_ref, w2_ref, col_ref, o_ref):
        x = x_ref[0]                                        # (C, N) f32

        # Boundary masks for ReflectionPad2d(1), computed once per image and
        # reused by both convolutions.
        n_idx = jax.lax.broadcasted_iota(jnp.int32, (C, N), 1)
        col = jnp.broadcast_to(col_ref[...], (C, N))        # w index per lane
        top = n_idx < W                                     # row h == 0
        bot = n_idx >= (H - 1) * W                          # row h == H-1
        lft_edge = col == 0                                 # col w == 0
        rgt_edge = col == W - 1                             # col w == W-1

        def neighbors_bf16(t):
            # 9 reflect-padded 3x3 neighbors of t (C, N), via lane rolls only.
            # pltpu.roll matches jnp.roll: roll(t, s)[n] == t[n - s mod N].
            # Each neighbor is cast to bf16 exactly once (MXU operand dtype),
            # letting the f32 roll/select temporaries die immediately.
            up = pltpu.roll(t, W, axis=1)                   # value from (h-1, w)
            dn = pltpu.roll(t, N - W, axis=1)               # value from (h+1, w)
            r_up = jnp.where(top, dn, up)                   # reflect h=-1 -> 1
            r_dn = jnp.where(bot, up, dn)                   # reflect h=H -> H-2
            nbrs = []
            for r in (r_up, t, r_dn):                       # dy = -1, 0, +1
                l = pltpu.roll(r, 1, axis=1)                # value from (., w-1)
                rr = pltpu.roll(r, N - 1, axis=1)           # value from (., w+1)
                nbrs.append(jnp.where(lft_edge, rr, l).astype(jnp.bfloat16))
                nbrs.append(r.astype(jnp.bfloat16))
                nbrs.append(jnp.where(rgt_edge, l, rr).astype(jnp.bfloat16))
            return nbrs                                     # order == (ky, kx) row-major

        def conv3x3(t, w_ref):
            # Reflect-padded 3x3 conv, (C, N) f32 -> (C, N) f32.
            # Bias omitted: it cancels under the affine-free InstanceNorm below.
            nbrs = neighbors_bf16(t)
            taps = [w_ref[k] for k in range(9)]             # (C_out, C_in) bf16
            pieces = []
            for c0 in range(0, N, TILE_N):
                c1 = min(c0 + TILE_N, N)
                acc = jnp.dot(taps[0], nbrs[0][:, c0:c1],
                              preferred_element_type=jnp.float32)
                for k in range(1, 9):
                    acc = acc + jnp.dot(taps[k], nbrs[k][:, c0:c1],
                                        preferred_element_type=jnp.float32)
                pieces.append(acc)
            return pieces[0] if len(pieces) == 1 else jnp.concatenate(pieces, axis=1)

        def instance_norm(y):                               # affine=False, biased var
            mean = jnp.mean(y, axis=1, keepdims=True)
            d = y - mean
            var = jnp.mean(d * d, axis=1, keepdims=True)
            return d * jax.lax.rsqrt(var + EPS)

        h = jnp.maximum(instance_norm(conv3x3(x, w1_ref)), 0.0)   # conv1 + IN + ReLU
        # TODO(synk): nn.Dropout(0.5) branch (use_dropout=True) not implemented;
        # this block corresponds to use_dropout=False.
        h = instance_norm(conv3x3(h, w2_ref))                     # conv2 + IN
        o_ref[0] = x + h                                          # residual

    return kernel


def resnet_block(x, w1, b1, w2, b2):
    """x: (B, C, H, W) f32; w*: (C, C, 3, 3) OIHW; b*: (C,)."""
    # Per-channel conv bias is exactly cancelled by the affine-free InstanceNorm
    # that follows each conv (mean subtraction removes it, variance unchanged).
    del b1, b2
    B, C, H, W = x.shape
    N = H * W

    xf = x.reshape(B, C, N)                                 # lane-dense layout
    # (ky, kx, C_out, C_in) flattened to (9, C_out, C_in), bf16, DMA'd once
    # (constant index_map -> block reused across all grid steps).
    w1f = jnp.transpose(w1, (2, 3, 0, 1)).reshape(9, C, C).astype(jnp.bfloat16)
    w2f = jnp.transpose(w2, (2, 3, 0, 1)).reshape(9, C, C).astype(jnp.bfloat16)
    col = (jnp.arange(N, dtype=jnp.int32) % W).reshape(1, N)

    out = pl.pallas_call(
        _make_kernel(C, H, W),
        out_shape=jax.ShapeDtypeStruct((B, C, N), jnp.float32),
        grid=(B,),
        in_specs=[
            pl.BlockSpec((1, C, N), lambda b: (b, 0, 0)),
            pl.BlockSpec((9, C, C), lambda b: (0, 0, 0)),
            pl.BlockSpec((9, C, C), lambda b: (0, 0, 0)),
            pl.BlockSpec((1, N), lambda b: (0, 0)),
        ],
        out_specs=pl.BlockSpec((1, C, N), lambda b: (b, 0, 0)),
        compiler_params=pltpu.CompilerParams(
            dimension_semantics=("parallel",),
            vmem_limit_bytes=64 * 1024 * 1024),
    )(xf, w1f, w2f, col)
    # TODO(synk): for production CycleGAN sizes (C=256, 64x64) on v7x, tile
    # C_out / row bands so the 9 bf16 neighbor planes stay within 64 MiB VMEM.
    return out.reshape(B, C, H, W)


def reference(x, w1, b1, w2, b2):
    """Pure-JAX f32 reference mirroring the PyTorch forward (with biases)."""
    def rpad(t):
        return jnp.pad(t, ((0, 0), (0, 0), (1, 1), (1, 1)), mode="reflect")

    def conv(t, w, b):
        y = jax.lax.conv_general_dilated(
            rpad(t), w, (1, 1), "VALID",
            dimension_numbers=("NCHW", "OIHW", "NCHW"),
            precision=jax.lax.Precision.HIGHEST)
        return y + b[None, :, None, None]

    def inorm(t):
        m = jnp.mean(t, axis=(2, 3), keepdims=True)
        v = jnp.mean((t - m) ** 2, axis=(2, 3), keepdims=True)
        return (t - m) * jax.lax.rsqrt(v + EPS)

    h = jax.nn.relu(inorm(conv(x, w1, b1)))
    h = inorm(conv(h, w2, b2))
    return x + h


if __name__ == "__main__":
    B, C, H, W = 2, 4, 16, 16
    key = jax.random.PRNGKey(0)
    kx, kw1, kb1, kw2, kb2 = jax.random.split(key, 5)

    x = jax.random.normal(kx, (B, C, H, W), jnp.float32)
    # Deterministic synthetic conv parameters (Conv2d(dim, dim, 3, bias=True)).
    fan_in = C * 3 * 3
    w1 = jax.random.normal(kw1, (C, C, 3, 3), jnp.float32) / jnp.sqrt(fan_in)
    b1 = jax.random.normal(kb1, (C,), jnp.float32) * 0.05
    w2 = jax.random.normal(kw2, (C, C, 3, 3), jnp.float32) / jnp.sqrt(fan_in)
    b2 = jax.random.normal(kb2, (C,), jnp.float32) * 0.05

    out = jax.block_until_ready(resnet_block(x, w1, b1, w2, b2))
    ref = jax.block_until_ready(reference(x, w1, b1, w2, b2))

    assert out.shape == (B, C, H, W)
    max_err = float(jnp.max(jnp.abs(out - ref)))
    # bf16 MXU operands (f32 accumulation) vs f32 HIGHEST reference -> loosened tol.
    assert jnp.allclose(out, ref, rtol=5e-2, atol=5e-2), max_err

    print("KERNEL_OK")
</pallas_src>

<mosaic_0001>
module attributes {stable_mosaic.version = 11 : i64} {
  func.func @kernel(%arg0: i32, %arg1: memref<1x4x256xf32, #tpu.memory_space<vmem>>, %arg2: memref<9x4x4xbf16, #tpu.memory_space<vmem>>, %arg3: memref<9x4x4xbf16, #tpu.memory_space<vmem>>, %arg4: memref<1x256xi32, #tpu.memory_space<vmem>>, %arg5: memref<1x4x256xf32, #tpu.memory_space<vmem>>) attributes {dimension_semantics = [#tpu.dimension_semantics<parallel>], iteration_bounds = array<i64: 2>, scalar_prefetch = 0 : i64, scratch_operands = 0 : i64, tpu.core_type = #tpu.core_type<tc>, window_params = [{transform_indices = @transform_0, window_bounds = array<i64: 1, 4, 256>}, {pipeline_mode = #tpu.pipeline_mode<synchronous>, transform_indices = @transform_1, window_bounds = array<i64: 9, 4, 4>}, {pipeline_mode = #tpu.pipeline_mode<synchronous>, transform_indices = @transform_2, window_bounds = array<i64: 9, 4, 4>}, {pipeline_mode = #tpu.pipeline_mode<synchronous>, transform_indices = @transform_3, window_bounds = array<i64: 1, 256>}, {transform_indices = @transform_4, window_bounds = array<i64: 1, 4, 256>}]} {
    %c0 = arith.constant 0 : index
    %c0_0 = arith.constant 0 : index
    %c0_1 = arith.constant 0 : index
    %0 = vector.load %arg1[%c0, %c0_0, %c0_1] : memref<1x4x256xf32, #tpu.memory_space<vmem>>, vector<1x4x256xf32>
    %1 = vector.shape_cast %0 : vector<1x4x256xf32> to vector<4x256xf32>
    %2 = tpu.iota {dimensions = array<i32: 1>} : vector<4x256xi32>
    %c0_2 = arith.constant 0 : index
    %c0_3 = arith.constant 0 : index
    %3 = vector.load %arg4[%c0_2, %c0_3] : memref<1x256xi32, #tpu.memory_space<vmem>>, vector<1x256xi32>
    %4 = vector.shape_cast %3 : vector<1x256xi32> to vector<1x256xi32>
    %5 = vector.broadcast %4 : vector<1x256xi32> to vector<4x256xi32>
    %c16_i32 = arith.constant 16 : i32
    %6 = vector.broadcast %c16_i32 : i32 to vector<4x256xi32>
    %7 = arith.cmpi slt, %2, %6 : vector<4x256xi32>
    %c240_i32 = arith.constant 240 : i32
    %8 = vector.broadcast %c240_i32 : i32 to vector<4x256xi32>
    %9 = arith.cmpi sge, %2, %8 : vector<4x256xi32>
    %c0_i32 = arith.constant 0 : i32
    %10 = vector.broadcast %c0_i32 : i32 to vector<4x256xi32>
    %11 = arith.cmpi eq, %5, %10 : vector<4x256xi32>
    %c15_i32 = arith.constant 15 : i32
    %12 = vector.broadcast %c15_i32 : i32 to vector<4x256xi32>
    %13 = arith.cmpi eq, %5, %12 : vector<4x256xi32>
    %c16_i32_4 = arith.constant 16 : i32
    %14 = tpu.dynamic_rotate %1 by %c16_i32_4 dim 1 : vector<4x256xf32>, i32 -> vector<4x256xf32>
    %c240_i32_5 = arith.constant 240 : i32
    %15 = tpu.dynamic_rotate %1 by %c240_i32_5 dim 1 : vector<4x256xf32>, i32 -> vector<4x256xf32>
    %16 = arith.select %7, %15, %14 : vector<4x256xi1>, vector<4x256xf32>
    %17 = arith.select %9, %14, %15 : vector<4x256xi1>, vector<4x256xf32>
    %c1_i32 = arith.constant 1 : i32
    %18 = tpu.dynamic_rotate %16 by %c1_i32 dim 1 : vector<4x256xf32>, i32 -> vector<4x256xf32>
    %c255_i32 = arith.constant 255 : i32
    %19 = tpu.dynamic_rotate %16 by %c255_i32 dim 1 : vector<4x256xf32>, i32 -> vector<4x256xf32>
    %20 = arith.select %11, %19, %18 : vector<4x256xi1>, vector<4x256xf32>
    %21 = arith.truncf %20 : vector<4x256xf32> to vector<4x256xbf16>
    %22 = arith.truncf %16 : vector<4x256xf32> to vector<4x256xbf16>
    %23 = arith.select %13, %18, %19 : vector<4x256xi1>, vector<4x256xf32>
    %24 = arith.truncf %23 : vector<4x256xf32> to vector<4x256xbf16>
    %c1_i32_6 = arith.constant 1 : i32
    %25 = tpu.dynamic_rotate %1 by %c1_i32_6 dim 1 : vector<4x256xf32>, i32 -> vector<4x256xf32>
    %c255_i32_7 = arith.constant 255 : i32
    %26 = tpu.dynamic_rotate %1 by %c255_i32_7 dim 1 : vector<4x256xf32>, i32 -> vector<4x256xf32>
    %27 = arith.select %11, %26, %25 : vector<4x256xi1>, vector<4x256xf32>
    %28 = arith.truncf %27 : vector<4x256xf32> to vector<4x256xbf16>
    %29 = arith.truncf %1 : vector<4x256xf32> to vector<4x256xbf16>
    %30 = arith.select %13, %25, %26 : vector<4x256xi1>, vector<4x256xf32>
    %31 = arith.truncf %30 : vector<4x256xf32> to vector<4x256xbf16>
    %c1_i32_8 = arith.constant 1 : i32
    %32 = tpu.dynamic_rotate %17 by %c1_i32_8 dim 1 : vector<4x256xf32>, i32 -> vector<4x256xf32>
    %c255_i32_9 = arith.constant 255 : i32
    %33 = tpu.dynamic_rotate %17 by %c255_i32_9 dim 1 : vector<4x256xf32>, i32 -> vector<4x256xf32>
    %34 = arith.select %11, %33, %32 : vector<4x256xi1>, vector<4x256xf32>
    %35 = arith.truncf %34 : vector<4x256xf32> to vector<4x256xbf16>
    %36 = arith.truncf %17 : vector<4x256xf32> to vector<4x256xbf16>
    %37 = arith.select %13, %32, %33 : vector<4x256xi1>, vector<4x256xf32>
    %38 = arith.truncf %37 : vector<4x256xf32> to vector<4x256xbf16>
    %c0_10 = arith.constant 0 : index
    %c0_11 = arith.constant 0 : index
    %c0_12 = arith.constant 0 : index
    %39 = vector.load %arg2[%c0_10, %c0_11, %c0_12] : memref<9x4x4xbf16, #tpu.memory_space<vmem>>, vector<1x4x4xbf16>
    %40 = vector.shape_cast %39 : vector<1x4x4xbf16> to vector<4x4xbf16>
    %c1 = arith.constant 1 : index
    %c0_13 = arith.constant 0 : index
    %c0_14 = arith.constant 0 : index
    %41 = vector.load %arg2[%c1, %c0_13, %c0_14] : memref<9x4x4xbf16, #tpu.memory_space<vmem>>, vector<1x4x4xbf16>
    %42 = vector.shape_cast %41 : vector<1x4x4xbf16> to vector<4x4xbf16>
    %c2 = arith.constant 2 : index
    %c0_15 = arith.constant 0 : index
    %c0_16 = arith.constant 0 : index
    %43 = vector.load %arg2[%c2, %c0_15, %c0_16] : memref<9x4x4xbf16, #tpu.memory_space<vmem>>, vector<1x4x4xbf16>
    %44 = vector.shape_cast %43 : vector<1x4x4xbf16> to vector<4x4xbf16>
    %c3 = arith.constant 3 : index
    %c0_17 = arith.constant 0 : index
    %c0_18 = arith.constant 0 : index
    %45 = vector.load %arg2[%c3, %c0_17, %c0_18] : memref<9x4x4xbf16, #tpu.memory_space<vmem>>, vector<1x4x4xbf16>
    %46 = vector.shape_cast %45 : vector<1x4x4xbf16> to vector<4x4xbf16>
    %c4 = arith.constant 4 : index
    %c0_19 = arith.constant 0 : index
    %c0_20 = arith.constant 0 : index
    %47 = vector.load %arg2[%c4, %c0_19, %c0_20] : memref<9x4x4xbf16, #tpu.memory_space<vmem>>, vector<1x4x4xbf16>
    %48 = vector.shape_cast %47 : vector<1x4x4xbf16> to vector<4x4xbf16>
    %c5 = arith.constant 5 : index
    %c0_21 = arith.constant 0 : index
    %c0_22 = arith.constant 0 : index
    %49 = vector.load %arg2[%c5, %c0_21, %c0_22] : memref<9x4x4xbf16, #tpu.memory_space<vmem>>, vector<1x4x4xbf16>
    %50 = vector.shape_cast %49 : vector<1x4x4xbf16> to vector<4x4xbf16>
    %c6 = arith.constant 6 : index
    %c0_23 = arith.constant 0 : index
    %c0_24 = arith.constant 0 : index
    %51 = vector.load %arg2[%c6, %c0_23, %c0_24] : memref<9x4x4xbf16, #tpu.memory_space<vmem>>, vector<1x4x4xbf16>
    %52 = vector.shape_cast %51 : vector<1x4x4xbf16> to vector<4x4xbf16>
    %c7 = arith.constant 7 : index
    %c0_25 = arith.constant 0 : index
    %c0_26 = arith.constant 0 : index
    %53 = vector.load %arg2[%c7, %c0_25, %c0_26] : memref<9x4x4xbf16, #tpu.memory_space<vmem>>, vector<1x4x4xbf16>
    %54 = vector.shape_cast %53 : vector<1x4x4xbf16> to vector<4x4xbf16>
    %c8 = arith.constant 8 : index
    %c0_27 = arith.constant 0 : index
    %c0_28 = arith.constant 0 : index
    %55 = vector.load %arg2[%c8, %c0_27, %c0_28] : memref<9x4x4xbf16, #tpu.memory_space<vmem>>, vector<1x4x4xbf16>
    %56 = vector.shape_cast %55 : vector<1x4x4xbf16> to vector<4x4xbf16>
    %cst = arith.constant dense<0.000000e+00> : vector<4x256xf32>
    %57 = tpu.matmul %40, %21, %cst {dimension_numbers = #tpu.dot_dimension_numbers<[1], [0], [0], [1], [0, 0, 1, 1], [], []>} : vector<4x4xbf16>, vector<4x256xbf16>, vector<4x256xf32> -> vector<4x256xf32>
    %cst_29 = arith.constant dense<0.000000e+00> : vector<4x256xf32>
    %58 = tpu.matmul %42, %22, %cst_29 {dimension_numbers = #tpu.dot_dimension_numbers<[1], [0], [0], [1], [0, 0, 1, 1], [], []>} : vector<4x4xbf16>, vector<4x256xbf16>, vector<4x256xf32> -> vector<4x256xf32>
    %59 = arith.addf %57, %58 : vector<4x256xf32>
    %cst_30 = arith.constant dense<0.000000e+00> : vector<4x256xf32>
    %60 = tpu.matmul %44, %24, %cst_30 {dimension_numbers = #tpu.dot_dimension_numbers<[1], [0], [0], [1], [0, 0, 1, 1], [], []>} : vector<4x4xbf16>, vector<4x256xbf16>, vector<4x256xf32> -> vector<4x256xf32>
    %61 = arith.addf %59, %60 : vector<4x256xf32>
    %cst_31 = arith.constant dense<0.000000e+00> : vector<4x256xf32>
    %62 = tpu.matmul %46, %28, %cst_31 {dimension_numbers = #tpu.dot_dimension_numbers<[1], [0], [0], [1], [0, 0, 1, 1], [], []>} : vector<4x4xbf16>, vector<4x256xbf16>, vector<4x256xf32> -> vector<4x256xf32>
    %63 = arith.addf %61, %62 : vector<4x256xf32>
    %cst_32 = arith.constant dense<0.000000e+00> : vector<4x256xf32>
    %64 = tpu.matmul %48, %29, %cst_32 {dimension_numbers = #tpu.dot_dimension_numbers<[1], [0], [0], [1], [0, 0, 1, 1], [], []>} : vector<4x4xbf16>, vector<4x256xbf16>, vector<4x256xf32> -> vector<4x256xf32>
    %65 = arith.addf %63, %64 : vector<4x256xf32>
    %cst_33 = arith.constant dense<0.000000e+00> : vector<4x256xf32>
    %66 = tpu.matmul %50, %31, %cst_33 {dimension_numbers = #tpu.dot_dimension_numbers<[1], [0], [0], [1], [0, 0, 1, 1], [], []>} : vector<4x4xbf16>, vector<4x256xbf16>, vector<4x256xf32> -> vector<4x256xf32>
    %67 = arith.addf %65, %66 : vector<4x256xf32>
    %cst_34 = arith.constant dense<0.000000e+00> : vector<4x256xf32>
    %68 = tpu.matmul %52, %35, %cst_34 {dimension_numbers = #tpu.dot_dimension_numbers<[1], [0], [0], [1], [0, 0, 1, 1], [], []>} : vector<4x4xbf16>, vector<4x256xbf16>, vector<4x256xf32> -> vector<4x256xf32>
    %69 = arith.addf %67, %68 : vector<4x256xf32>
    %cst_35 = arith.constant dense<0.000000e+00> : vector<4x256xf32>
    %70 = tpu.matmul %54, %36, %cst_35 {dimension_numbers = #tpu.dot_dimension_numbers<[1], [0], [0], [1], [0, 0, 1, 1], [], []>} : vector<4x4xbf16>, vector<4x256xbf16>, vector<4x256xf32> -> vector<4x256xf32>
    %71 = arith.addf %69, %70 : vector<4x256xf32>
    %cst_36 = arith.constant dense<0.000000e+00> : vector<4x256xf32>
    %72 = tpu.matmul %56, %38, %cst_36 {dimension_numbers = #tpu.dot_dimension_numbers<[1], [0], [0], [1], [0, 0, 1, 1], [], []>} : vector<4x4xbf16>, vector<4x256xbf16>, vector<4x256xf32> -> vector<4x256xf32>
    %73 = arith.addf %71, %72 : vector<4x256xf32>
    %cst_37 = arith.constant dense<0.000000e+00> : vector<4xf32>
    %74 = vector.multi_reduction <add>, %73, %cst_37 [1] : vector<4x256xf32> to vector<4xf32>
    %75 = vector.shape_cast %74 : vector<4xf32> to vector<4x1xf32>
    %cst_38 = arith.constant 2.560000e+02 : f32
    %76 = vector.broadcast %cst_38 : f32 to vector<4x1xf32>
    %77 = arith.divf %75, %76 : vector<4x1xf32>
    %78 = vector.broadcast %77 : vector<4x1xf32> to vector<4x256xf32>
    %79 = arith.subf %73, %78 : vector<4x256xf32>
    %80 = arith.mulf %79, %79 : vector<4x256xf32>
    %cst_39 = arith.constant dense<0.000000e+00> : vector<4xf32>
    %81 = vector.multi_reduction <add>, %80, %cst_39 [1] : vector<4x256xf32> to vector<4xf32>
    %82 = vector.shape_cast %81 : vector<4xf32> to vector<4x1xf32>
    %cst_40 = arith.constant 2.560000e+02 : f32
    %83 = vector.broadcast %cst_40 : f32 to vector<4x1xf32>
    %84 = arith.divf %82, %83 : vector<4x1xf32>
    %cst_41 = arith.constant 9.99999974E-6 : f32
    %85 = vector.broadcast %cst_41 : f32 to vector<4x1xf32>
    %86 = arith.addf %84, %85 : vector<4x1xf32>
    %87 = math.rsqrt %86 : vector<4x1xf32>
    %88 = vector.broadcast %87 : vector<4x1xf32> to vector<4x256xf32>
    %89 = arith.mulf %79, %88 : vector<4x256xf32>
    %cst_42 = arith.constant 0.000000e+00 : f32
    %90 = vector.broadcast %cst_42 : f32 to vector<4x256xf32>
    %91 = arith.maximumf %89, %90 : vector<4x256xf32>
    %c16_i32_43 = arith.constant 16 : i32
    %92 = tpu.dynamic_rotate %91 by %c16_i32_43 dim 1 : vector<4x256xf32>, i32 -> vector<4x256xf32>
    %c240_i32_44 = arith.constant 240 : i32
    %93 = tpu.dynamic_rotate %91 by %c240_i32_44 dim 1 : vector<4x256xf32>, i32 -> vector<4x256xf32>
    %94 = arith.select %7, %93, %92 : vector<4x256xi1>, vector<4x256xf32>
    %95 = arith.select %9, %92, %93 : vector<4x256xi1>, vector<4x256xf32>
    %c1_i32_45 = arith.constant 1 : i32
    %96 = tpu.dynamic_rotate %94 by %c1_i32_45 dim 1 : vector<4x256xf32>, i32 -> vector<4x256xf32>
    %c255_i32_46 = arith.constant 255 : i32
    %97 = tpu.dynamic_rotate %94 by %c255_i32_46 dim 1 : vector<4x256xf32>, i32 -> vector<4x256xf32>
    %98 = arith.select %11, %97, %96 : vector<4x256xi1>, vector<4x256xf32>
    %99 = arith.truncf %98 : vector<4x256xf32> to vector<4x256xbf16>
    %100 = arith.truncf %94 : vector<4x256xf32> to vector<4x256xbf16>
    %101 = arith.select %13, %96, %97 : vector<4x256xi1>, vector<4x256xf32>
    %102 = arith.truncf %101 : vector<4x256xf32> to vector<4x256xbf16>
    %c1_i32_47 = arith.constant 1 : i32
    %103 = tpu.dynamic_rotate %91 by %c1_i32_47 dim 1 : vector<4x256xf32>, i32 -> vector<4x256xf32>
    %c255_i32_48 = arith.constant 255 : i32
    %104 = tpu.dynamic_rotate %91 by %c255_i32_48 dim 1 : vector<4x256xf32>, i32 -> vector<4x256xf32>
    %105 = arith.select %11, %104, %103 : vector<4x256xi1>, vector<4x256xf32>
    %106 = arith.truncf %105 : vector<4x256xf32> to vector<4x256xbf16>
    %107 = arith.truncf %91 : vector<4x256xf32> to vector<4x256xbf16>
    %108 = arith.select %13, %103, %104 : vector<4x256xi1>, vector<4x256xf32>
    %109 = arith.truncf %108 : vector<4x256xf32> to vector<4x256xbf16>
    %c1_i32_49 = arith.constant 1 : i32
    %110 = tpu.dynamic_rotate %95 by %c1_i32_49 dim 1 : vector<4x256xf32>, i32 -> vector<4x256xf32>
    %c255_i32_50 = arith.constant 255 : i32
    %111 = tpu.dynamic_rotate %95 by %c255_i32_50 dim 1 : vector<4x256xf32>, i32 -> vector<4x256xf32>
    %112 = arith.select %11, %111, %110 : vector<4x256xi1>, vector<4x256xf32>
    %113 = arith.truncf %112 : vector<4x256xf32> to vector<4x256xbf16>
    %114 = arith.truncf %95 : vector<4x256xf32> to vector<4x256xbf16>
    %115 = arith.select %13, %110, %111 : vector<4x256xi1>, vector<4x256xf32>
    %116 = arith.truncf %115 : vector<4x256xf32> to vector<4x256xbf16>
    %c0_51 = arith.constant 0 : index
    %c0_52 = arith.constant 0 : index
    %c0_53 = arith.constant 0 : index
    %117 = vector.load %arg3[%c0_51, %c0_52, %c0_53] : memref<9x4x4xbf16, #tpu.memory_space<vmem>>, vector<1x4x4xbf16>
    %118 = vector.shape_cast %117 : vector<1x4x4xbf16> to vector<4x4xbf16>
    %c1_54 = arith.constant 1 : index
    %c0_55 = arith.constant 0 : index
    %c0_56 = arith.constant 0 : index
    %119 = vector.load %arg3[%c1_54, %c0_55, %c0_56] : memref<9x4x4xbf16, #tpu.memory_space<vmem>>, vector<1x4x4xbf16>
    %120 = vector.shape_cast %119 : vector<1x4x4xbf16> to vector<4x4xbf16>
    %c2_57 = arith.constant 2 : index
    %c0_58 = arith.constant 0 : index
    %c0_59 = arith.constant 0 : index
    %121 = vector.load %arg3[%c2_57, %c0_58, %c0_59] : memref<9x4x4xbf16, #tpu.memory_space<vmem>>, vector<1x4x4xbf16>
    %122 = vector.shape_cast %121 : vector<1x4x4xbf16> to vector<4x4xbf16>
    %c3_60 = arith.constant 3 : index
    %c0_61 = arith.constant 0 : index
    %c0_62 = arith.constant 0 : index
    %123 = vector.load %arg3[%c3_60, %c0_61, %c0_62] : memref<9x4x4xbf16, #tpu.memory_space<vmem>>, vector<1x4x4xbf16>
    %124 = vector.shape_cast %123 : vector<1x4x4xbf16> to vector<4x4xbf16>
    %c4_63 = arith.constant 4 : index
    %c0_64 = arith.constant 0 : index
    %c0_65 = arith.constant 0 : index
    %125 = vector.load %arg3[%c4_63, %c0_64, %c0_65] : memref<9x4x4xbf16, #tpu.memory_space<vmem>>, vector<1x4x4xbf16>
    %126 = vector.shape_cast %125 : vector<1x4x4xbf16> to vector<4x4xbf16>
    %c5_66 = arith.constant 5 : index
    %c0_67 = arith.constant 0 : index
    %c0_68 = arith.constant 0 : index
    %127 = vector.load %arg3[%c5_66, %c0_67, %c0_68] : memref<9x4x4xbf16, #tpu.memory_space<vmem>>, vector<1x4x4xbf16>
    %128 = vector.shape_cast %127 : vector<1x4x4xbf16> to vector<4x4xbf16>
    %c6_69 = arith.constant 6 : index
    %c0_70 = arith.constant 0 : index
    %c0_71 = arith.constant 0 : index
    %129 = vector.load %arg3[%c6_69, %c0_70, %c0_71] : memref<9x4x4xbf16, #tpu.memory_space<vmem>>, vector<1x4x4xbf16>
    %130 = vector.shape_cast %129 : vector<1x4x4xbf16> to vector<4x4xbf16>
    %c7_72 = arith.constant 7 : index
    %c0_73 = arith.constant 0 : index
    %c0_74 = arith.constant 0 : index
    %131 = vector.load %arg3[%c7_72, %c0_73, %c0_74] : memref<9x4x4xbf16, #tpu.memory_space<vmem>>, vector<1x4x4xbf16>
    %132 = vector.shape_cast %131 : vector<1x4x4xbf16> to vector<4x4xbf16>
    %c8_75 = arith.constant 8 : index
    %c0_76 = arith.constant 0 : index
    %c0_77 = arith.constant 0 : index
    %133 = vector.load %arg3[%c8_75, %c0_76, %c0_77] : memref<9x4x4xbf16, #tpu.memory_space<vmem>>, vector<1x4x4xbf16>
    %134 = vector.shape_cast %133 : vector<1x4x4xbf16> to vector<4x4xbf16>
    %cst_78 = arith.constant dense<0.000000e+00> : vector<4x256xf32>
    %135 = tpu.matmul %118, %99, %cst_78 {dimension_numbers = #tpu.dot_dimension_numbers<[1], [0], [0], [1], [0, 0, 1, 1], [], []>} : vector<4x4xbf16>, vector<4x256xbf16>, vector<4x256xf32> -> vector<4x256xf32>
    %cst_79 = arith.constant dense<0.000000e+00> : vector<4x256xf32>
    %136 = tpu.matmul %120, %100, %cst_79 {dimension_numbers = #tpu.dot_dimension_numbers<[1], [0], [0], [1], [0, 0, 1, 1], [], []>} : vector<4x4xbf16>, vector<4x256xbf16>, vector<4x256xf32> -> vector<4x256xf32>
    %137 = arith.addf %135, %136 : vector<4x256xf32>
    %cst_80 = arith.constant dense<0.000000e+00> : vector<4x256xf32>
    %138 = tpu.matmul %122, %102, %cst_80 {dimension_numbers = #tpu.dot_dimension_numbers<[1], [0], [0], [1], [0, 0, 1, 1], [], []>} : vector<4x4xbf16>, vector<4x256xbf16>, vector<4x256xf32> -> vector<4x256xf32>
    %139 = arith.addf %137, %138 : vector<4x256xf32>
    %cst_81 = arith.constant dense<0.000000e+00> : vector<4x256xf32>
    %140 = tpu.matmul %124, %106, %cst_81 {dimension_numbers = #tpu.dot_dimension_numbers<[1], [0], [0], [1], [0, 0, 1, 1], [], []>} : vector<4x4xbf16>, vector<4x256xbf16>, vector<4x256xf32> -> vector<4x256xf32>
    %141 = arith.addf %139, %140 : vector<4x256xf32>
    %cst_82 = arith.constant dense<0.000000e+00> : vector<4x256xf32>
    %142 = tpu.matmul %126, %107, %cst_82 {dimension_numbers = #tpu.dot_dimension_numbers<[1], [0], [0], [1], [0, 0, 1, 1], [], []>} : vector<4x4xbf16>, vector<4x256xbf16>, vector<4x256xf32> -> vector<4x256xf32>
    %143 = arith.addf %141, %142 : vector<4x256xf32>
    %cst_83 = arith.constant dense<0.000000e+00> : vector<4x256xf32>
    %144 = tpu.matmul %128, %109, %cst_83 {dimension_numbers = #tpu.dot_dimension_numbers<[1], [0], [0], [1], [0, 0, 1, 1], [], []>} : vector<4x4xbf16>, vector<4x256xbf16>, vector<4x256xf32> -> vector<4x256xf32>
    %145 = arith.addf %143, %144 : vector<4x256xf32>
    %cst_84 = arith.constant dense<0.000000e+00> : vector<4x256xf32>
    %146 = tpu.matmul %130, %113, %cst_84 {dimension_numbers = #tpu.dot_dimension_numbers<[1], [0], [0], [1], [0, 0, 1, 1], [], []>} : vector<4x4xbf16>, vector<4x256xbf16>, vector<4x256xf32> -> vector<4x256xf32>
    %147 = arith.addf %145, %146 : vector<4x256xf32>
    %cst_85 = arith.constant dense<0.000000e+00> : vector<4x256xf32>
    %148 = tpu.matmul %132, %114, %cst_85 {dimension_numbers = #tpu.dot_dimension_numbers<[1], [0], [0], [1], [0, 0, 1, 1], [], []>} : vector<4x4xbf16>, vector<4x256xbf16>, vector<4x256xf32> -> vector<4x256xf32>
    %149 = arith.addf %147, %148 : vector<4x256xf32>
    %cst_86 = arith.constant dense<0.000000e+00> : vector<4x256xf32>
    %150 = tpu.matmul %134, %116, %cst_86 {dimension_numbers = #tpu.dot_dimension_numbers<[1], [0], [0], [1], [0, 0, 1, 1], [], []>} : vector<4x4xbf16>, vector<4x256xbf16>, vector<4x256xf32> -> vector<4x256xf32>
    %151 = arith.addf %149, %150 : vector<4x256xf32>
    %cst_87 = arith.constant dense<0.000000e+00> : vector<4xf32>
    %152 = vector.multi_reduction <add>, %151, %cst_87 [1] : vector<4x256xf32> to vector<4xf32>
    %153 = vector.shape_cast %152 : vector<4xf32> to vector<4x1xf32>
    %cst_88 = arith.constant 2.560000e+02 : f32
    %154 = vector.broadcast %cst_88 : f32 to vector<4x1xf32>
    %155 = arith.divf %153, %154 : vector<4x1xf32>
    %156 = vector.broadcast %155 : vector<4x1xf32> to vector<4x256xf32>
    %157 = arith.subf %151, %156 : vector<4x256xf32>
    %158 = arith.mulf %157, %157 : vector<4x256xf32>
    %cst_89 = arith.constant dense<0.000000e+00> : vector<4xf32>
    %159 = vector.multi_reduction <add>, %158, %cst_89 [1] : vector<4x256xf32> to vector<4xf32>
    %160 = vector.shape_cast %159 : vector<4xf32> to vector<4x1xf32>
    %cst_90 = arith.constant 2.560000e+02 : f32
    %161 = vector.broadcast %cst_90 : f32 to vector<4x1xf32>
    %162 = arith.divf %160, %161 : vector<4x1xf32>
    %cst_91 = arith.constant 9.99999974E-6 : f32
    %163 = vector.broadcast %cst_91 : f32 to vector<4x1xf32>
    %164 = arith.addf %162, %163 : vector<4x1xf32>
    %165 = math.rsqrt %164 : vector<4x1xf32>
    %166 = vector.broadcast %165 : vector<4x1xf32> to vector<4x256xf32>
    %167 = arith.mulf %157, %166 : vector<4x256xf32>
    %168 = arith.addf %1, %167 : vector<4x256xf32>
    %c0_92 = arith.constant 0 : index
    %c0_93 = arith.constant 0 : index
    %c0_94 = arith.constant 0 : index
    %169 = vector.load %arg5[%c0_92, %c0_93, %c0_94] : memref<1x4x256xf32, #tpu.memory_space<vmem>>, vector<1x4x256xf32>
    %170 = vector.shape_cast %169 : vector<1x4x256xf32> to vector<4x256xf32>
    %171 = vector.shape_cast %168 : vector<4x256xf32> to vector<1x4x256xf32>
    tpu.vector_store %arg5[%c0_92, %c0_93, %c0_94], %171 {strides = array<i32>} : memref<1x4x256xf32, #tpu.memory_space<vmem>>, vector<1x4x256xf32>,
    return
  }
  func.func @transform_0(%arg0: i32) -> (i32, i32, i32) {
    %c0_i32 = arith.constant 0 : i32
    %c0_i32_0 = arith.constant 0 : i32
    %c0_i32_1 = arith.constant 0 : i32
    return %arg0, %c0_i32, %c0_i32_0 : i32, i32, i32
  }
  func.func @transform_1(%arg0: i32) -> (i32, i32, i32) {
    %c0_i32 = arith.constant 0 : i32
    %c0_i32_0 = arith.constant 0 : i32
    %c0_i32_1 = arith.constant 0 : i32
    %c0_i32_2 = arith.constant 0 : i32
    return %c0_i32, %c0_i32_0, %c0_i32_1 : i32, i32, i32
  }
  func.func @transform_2(%arg0: i32) -> (i32, i32, i32) {
    %c0_i32 = arith.constant 0 : i32
    %c0_i32_0 = arith.constant 0 : i32
    %c0_i32_1 = arith.constant 0 : i32
    %c0_i32_2 = arith.constant 0 : i32
    return %c0_i32, %c0_i32_0, %c0_i32_1 : i32, i32, i32
  }
  func.func @transform_3(%arg0: i32) -> (i32, i32) {
    %c0_i32 = arith.constant 0 : i32
    %c0_i32_0 = arith.constant 0 : i32
    %c0_i32_1 = arith.constant 0 : i32
    return %c0_i32, %c0_i32_0 : i32, i32
  }
  func.func @transform_4(%arg0: i32) -> (i32, i32, i32) {
    %c0_i32 = arith.constant 0 : i32
    %c0_i32_0 = arith.constant 0 : i32
    %c0_i32_1 = arith.constant 0 : i32
    return %arg0, %c0_i32, %c0_i32_0 : i32, i32, i32
  }
}

</mosaic_0001>

<bundles_post_ra>
// kernel: tpu_custom_call.1
= control target key start
LH: loop header
LB: loop body
LE: loop exit
PB: predicated region body
PF: predicated region fallthrough
CT: control target
= control target key end

     0   :  { %9 = vsyncpa [#allocation3], 0  ;;  %s2187_s0 = inlined_call_operand.vmem [shape: f32[2,4,256], index: 0, kind: input, shape index: {}]   ;;  %s2188_s1 = inlined_call_operand.vmem [shape: bf16[9,4,4], index: 1, kind: input, shape index: {}]   ;;  %s2189_s2 = inlined_call_operand.vmem [shape: bf16[9,4,4], index: 2, kind: input, shape index: {}]   ;;  %s2190_s3 = inlined_call_operand.vmem [shape: s32[1,256], index: 3, kind: input, shape index: {}]   ;;  %s2191_s4 = inlined_call_operand.hbm [shape: f32[2,4,256], index: 4, kind: output, shape index: {}]  }
   0x1   :  { %11 = vsyncpa [#allocation3 + $0x1], 0  ;;  %s1764_s15 = smov 0   ;;  %s1766_s16 = smov 0  }
   0x2   :  { %s1768_s17 = smov 0   ;;  %s1770_s18 = smov 0  }
   0x3 LB: > { %s1785_s19 = sadd.s32 4294967295, %s1731_s18   ;;  %s1476_s20 = sadd.s32 4294967294, %s1731_s18   ;;  %s1731_s18 = sphi %s1770_s18, %s2197_s18   ;;  %s1727_s17 = sphi %s1768_s17, %s2196_s17   ;;  %s1723_s16 = sphi %s1766_s16, %s2195_s16   ;;  %s1719_s15 = sphi %s1764_s15, %s2194_s15  }
   0x4   : > { %s1789_s21 = sadd.s32 1, %s1731_s18   ;;  %s113_s22 = sadd.s32 1, %s1727_s17 }
   0x5   : > { %s110_s23 = ssub.s32 %s1731_s18, %s1789_s21  ;;  %p123_p0 = scmp.ne.s32.totalorder %s1727_s17, %s1723_s16 }
   0x6   : > { %p111_p1 = scmp.eq.s32.totalorder %s110_s23, 0  ;;  %p124_p2 = scmp.eq.s32.totalorder %s1785_s19, 1 }
   0x7   : > { %p129_p3 = scmp.ne.s32.totalorder %s1723_s16, %s1719_s15  ;;  %p130_p4 = scmp.eq.s32.totalorder %s1476_s20, 1 }
   0x8   : > { %s1800_s24 = scalar_select %p111_p1, %s1727_s17, %s113_s22  }
   0x9   : > { %p1802_p5 = por %p124_p2, %p123_p0  ;;  %p1806_p6 = por %p130_p4, %p129_p3 }
   0xa   : > { %p1479_p7 = scmp.ge.s32.totalorder %s1731_s18, 1  ;;  %p165_p8 = scmp.lt.s32.totalorder %s1731_s18, 3 }
   0xc   : > { %p166_p9 = pnand %p1479_p7, %p165_p8 }
   0xd   : > { %p191_p10 = scmp.lt.s32.totalorder (!%p166_p9), %s1785_s19, 1  ;;  %s1733_s6 = smov (!%p166_p9), 16  }
   0xe   : > { %169 = sbr.rel (%p166_p9) target bundleno = 1613 (0x64d), region = 36  ;;  %s1734_s7 = smov (!%p166_p9), 112  }
   0xf   : > { %s1735_s8 = smov (!%p166_p9), 1   ;;  %s1737_s11 = smov (!%p166_p9), 127  }
  0x10   : > { %s1738_s10 = smov (!%p166_p9), [#allocation2]  }
  0x11   : > { %s1675_s12 = sshll.u32 (!%p166_p9), %s1738_s10, 4  ;;  %s1676_s12 = int_to_ptr.vmem [resolvable:$false] %s1675_s12 }
  0x13   : > { %s192_s27 = scalar_select %p191_p10, %s1785_s19, 1  ;;  %v198_v3 = vlaneseq  ;;  %v1736_v6 = vmov 0   ;;  %vm327_vm1 = vcmask 1041408   ;;  %v1483_v24 = vld [vmem:[%s2188_s1 + $0x2] sm:$0x3]  ;;  %vm323_vm4 = vcmask 31744  }
  0x14   : > { %366 = vmatprep.mubr.bf16.mxu0 %v1736_v6  ;;  %416 = vmatprep.mubr.bf16.mxu1 %v1736_v6  ;;  %v201_v27 = vld [vmem:[%s2190_s3] sm:$0x3]  ;;  %vm789_vm11 = vcmask 1043456  }
  0x15   : > { %s1540_s28 = sshll.u32 %s192_s27, 3  ;;  %v1828_v4 = vand.u32 127, %v198_v3  ;;  %v203_v25 = vshrl.u32 %v198_v3, 7 }
  0x16   : > { %s195_s5 = scalar_lea.vmem %s2187_s0, %s1540_s28 }
  0x17   : > { %v1817_v0 = vld [vmem:[%s195_s5] sm:$0xff]  ;;  %vm210_vm0 = vcmp.lt.s32.totalorder %v1828_v4, 16  ;;  %v1834_v9 = vadd.s32 128, %v1828_v4  ;;  %vm231_vm2 = vcmp.lt.s32.totalorder %v1828_v4, 112  ;;  %v208_v26 = vsub.s32 1, %v203_v25 }
  0x18   : > { %v1821_v1 = vcombine.high %v1817_v0, %v1817_v0  ;;  %v204_v28 = vsub.s32 0, %v203_v25  ;;  %vm242_vm5 = vcmp.lt.s32.totalorder %v1828_v4, 1  ;;  %vm249_vm6 = vcmp.lt.s32.totalorder %v1828_v4, 127 }
  0x19   : > { %vm213_vm3 = vcmp.ge.s32.totalorder %v1834_v9, 240  ;;  %v1872_v30 = vrot.slane %v201_v27, %v208_v26  ;;  %v278_v43 = vpack.c.bf16 %v1817_v0, %v1817_v0 }
  0x1a   : > { %v1586_v2 = vpack.i.bf16 %v1821_v1, %v1817_v0  ;;  %v1874_v32 = vrot.slane %v201_v27, %v204_v28  ;;  %v279_v42 = vpack.c.bf16 %v1821_v1, %v1821_v1 }
  0x1b   : > { %vm215_vm7 = vcmp.eq.s32.totalorder %v1872_v30, 0  ;;  %vm217_vm8 = vcmp.eq.s32.totalorder %v1872_v30, 15 }
  0x1c   : > { %1587 = vrot.lane.b32.xlu0 %v1586_v2, %s1733_s6  ;;  %vm214_vm9 = vcmp.eq.s32.totalorder %v1874_v32, 0  ;;  %vm216_vm10 = vcmp.eq.s32.totalorder %v1874_v32, 15  ;;  %v1514_v32 = vld [vmem:[%s2189_s2 + $0xc] sm:$0x3] }
  0x20   : > { %1592 = vrot.lane.b32.xlu0 %v1586_v2, %s1734_s7 }
  0x24   : > { %1607 = vrot.lane.b32.xlu0 %v1586_v2, %s1735_s8 }
  0x8e   : > { %v1588_v5 = vpop.permute.xlu0 %1587 }
  0x8f   : > { %v1590_v7 = vunpack.i.h.bf16 %v1588_v5  ;;  %v1589_v8 = vunpack.i.l.bf16 %v1588_v5 }
  0x91   : > { %v225_v10 = vsel %vm210_vm0, %v1589_v8, %v1590_v7  ;;  %v226_v17 = vsel %vm210_vm0, %v1590_v7, %v1589_v8 }
  0x92   : > { %v1593_v11 = vpop.permute.xlu0 %1592  ;;  %v257_v12 = vpack.c.bf16 %v225_v10, %v225_v10 }
  0x93   : > { %v1595_v13 = vunpack.i.h.bf16 %v1593_v11  ;;  %v1594_v14 = vunpack.i.l.bf16 %v1593_v11  ;;  %v306_v11 = vld [vmem:[%s2188_s1] sm:$0x3] }
  0x94   : > { %1491 = vmatprep.subr.msk.bf16.mxu0 %vm327_vm1, %v257_v12  ;;  %v1484_v12 = vld [vmem:[%s2188_s1 + $0x4] sm:$0x3] }
  0x95   : > { %v1843_v15 = vsel %vm231_vm2, %v1594_v14, %v1595_v13  ;;  %v233_v16 = vsel %vm231_vm2, %v1595_v13, %v1594_v14 }
  0x96   : > { %v234_v18 = vsel %vm210_vm0, %v1843_v15, %v226_v17  ;;  %v1854_v19 = vsel %vm213_vm3, %v225_v10, %v233_v16  ;;  %v1608_v31 = vpop.permute.xlu0 %1607  ;;  %v533_v17 = vsel %vm327_vm1, %v278_v43, 0  ;;  %v1488_v43 = vld [vmem:[%s2188_s1 + $0xc] sm:$0x3] }
  0x97   : > { %v1596_v20 = vpack.i.bf16 %v225_v10, %v234_v18  ;;  %v1616_v21 = vpack.i.bf16 %v1854_v19, %v1843_v15  ;;  %v256_v22 = vpack.c.bf16 %v234_v18, %v234_v18  ;;  %v1610_v33 = vunpack.i.h.bf16 %v1608_v31 }
  0x98   : > { %v1609_v34 = vunpack.i.l.bf16 %v1608_v31 }
  0x99   : > { %1597 = vrot.lane.b32.xlu1 %v1596_v20, %s1735_s8  ;;  %1617 = vrot.lane.b32.xlu0 %v1616_v21, %s1735_s8  ;;  %v329_v23 = vsel %vm327_vm1, %v256_v22, 0 }
  0x9a   : > { %349 = vmatpush1.bf16.msra.mxu0 %v329_v23  ;;  %v266_v40 = vsel %vm242_vm5, %v1609_v34, %v1610_v33  ;;  %v267_v41 = vsel %vm242_vm5, %v1610_v33, %v1609_v34  ;;  %v1485_v33 = vld [vmem:[%s2188_s1 + $0x6] sm:$0x3]  ;;  %v1486_v34 = vld [vmem:[%s2188_s1 + $0x8] sm:$0x3] }
  0x9d   : > { %1602 = vrot.lane.b32.xlu1 %v1596_v20, %s1737_s11  ;;  %1492 = vmatmul.mubr.msk.bf16.vlgmr.msra.gmra.mxu0 %vm323_vm4, %v1483_v24 }
  0x9e   : > { %466 = vmatprep.mubr.bf16.mxu0 %v1736_v6 }
  0xa1   : > { %1612 = vrot.lane.b32.xlu1 %v1586_v2, %s1737_s11 }
  0xa5   : > { %1622 = vrot.lane.b32.xlu1 %v1616_v21, %s1737_s11 }
 0x10b   : > { %v1598_v29 = vpop.permute.xlu1 %1597  ;;  %v1618_v44 = vpop.permute.xlu0 %1617 }
 0x10c   : > { %v1600_v35 = vunpack.i.h.bf16 %v1598_v29  ;;  %v1599_v36 = vunpack.i.l.bf16 %v1598_v29  ;;  %v1620_v58 = vunpack.i.h.bf16 %v1618_v44  ;;  %v1619_v59 = vunpack.i.l.bf16 %v1618_v44 }
 0x10e   : > { %v243_v45 = vsel %vm242_vm5, %v1599_v36, %v1600_v35  ;;  %v244_v47 = vsel %vm242_vm5, %v1600_v35, %v1599_v36  ;;  %v288_v16 = vsel %vm242_vm5, %v1619_v59, %v1620_v58  ;;  %v289_v24 = vsel %vm242_vm5, %v1620_v58, %v1619_v59 }
 0x10f   : > { %v1603_v37 = vpop.permute.xlu1 %1602 }
 0x110   : > { %v1605_v38 = vunpack.i.h.bf16 %v1603_v37  ;;  %v1604_v39 = vunpack.i.l.bf16 %v1603_v37 }
 0x112   : > { %v251_v46 = vsel %vm249_vm6, %v1605_v38, %v1604_v39  ;;  %v250_v48 = vsel %vm249_vm6, %v1604_v39, %v1605_v38  ;;  %v301_v38 = vpack.c.bf16 %v1854_v19, %v1854_v19  ;;  %v1487_v19 = vld [vmem:[%s2188_s1 + $0xa] sm:$0x3] }
 0x113   : > { %v1613_v49 = vpop.permute.xlu1 %1612  ;;  %v253_v50 = vsel %vm215_vm7, %v251_v46, %v243_v45  ;;  %v259_v51 = vsel %vm217_vm8, %v243_v45, %v251_v46  ;;  %v252_v52 = vsel %vm214_vm9, %v250_v48, %v244_v47  ;;  %v258_v53 = vsel %vm216_vm10, %v244_v47, %v250_v48  ;;  %v1490_v46 = vld [vmem:[%s2188_s1 + $0x10] sm:$0x3] }
 0x114   : > { %v1615_v54 = vunpack.i.h.bf16 %v1613_v49  ;;  %v1614_v55 = vunpack.i.l.bf16 %v1613_v49  ;;  %v255_v56 = vpack.c.bf16 %v253_v50, %v253_v50  ;;  %v261_v57 = vpack.c.bf16 %v259_v51, %v259_v51 }
 0x115   : > { %v254_v60 = vpack.c.bf16 %v252_v52, %v252_v52  ;;  %v260_v61 = vpack.c.bf16 %v258_v53, %v258_v53 }
 0x116   : > { %v272_v62 = vsel %vm249_vm6, %v1614_v55, %v1615_v54  ;;  %v273_v63 = vsel %vm249_vm6, %v1615_v54, %v1614_v55  ;;  %1493 = vmatprep.subr.msk.bf16.mxu1 %vm327_vm1, %v255_v56  ;;  %1495 = vmatprep.subr.msk.bf16.mxu0 %vm327_vm1, %v261_v57 }
 0x117   : > { %v379_v1 = vsel %vm327_vm1, %v254_v60, 0  ;;  %v429_v2 = vsel %vm327_vm1, %v260_v61, 0  ;;  %v1623_v3 = vpop.permute.xlu1 %1622  ;;  %v275_v5 = vsel %vm215_vm7, %v273_v63, %v266_v40  ;;  %v274_v7 = vsel %vm214_vm9, %v272_v62, %v267_v41 }
 0x118   : > { %399 = vmatpush1.bf16.msra.mxu1 %v379_v1  ;;  %449 = vmatpush1.bf16.msra.mxu0 %v429_v2  ;;  %v1625_v8 = vunpack.i.h.bf16 %v1623_v3  ;;  %v1624_v10 = vunpack.i.l.bf16 %v1623_v3  ;;  %v277_v13 = vpack.c.bf16 %v275_v5, %v275_v5  ;;  %v276_v14 = vpack.c.bf16 %v274_v7, %v274_v7 }
 0x119   : > { %1499 = vmatprep.subr.msk.bf16.mxu0 %vm327_vm1, %v279_v42  ;;  %v281_v18 = vsel %vm217_vm8, %v266_v40, %v273_v63  ;;  %v280_v27 = vsel %vm216_vm10, %v267_v41, %v272_v62  ;;  %v300_v41 = vpack.c.bf16 %v1843_v15, %v1843_v15  ;;  %v1489_v15 = vld [vmem:[%s2188_s1 + $0xe] sm:$0x3] }
 0x11a   : > { %v294_v20 = vsel %vm249_vm6, %v1624_v10, %v1625_v8  ;;  %v295_v21 = vsel %vm249_vm6, %v1625_v8, %v1624_v10  ;;  %1497 = vmatprep.subr.msk.bf16.mxu1 %vm327_vm1, %v277_v13  ;;  %v481_v22 = vsel %vm327_vm1, %v276_v14, 0  ;;  %v283_v23 = vpack.c.bf16 %v281_v18, %v281_v18 }
 0x11b   : > { %1494 = vmatmul.mubr.msk.bf16.vlgmr.msra.gmra.mxu1 %vm323_vm4, %v306_v11  ;;  %1496 = vmatmul.mubr.msk.bf16.vlgmr.msra.gmra.mxu0 %vm323_vm4, %v1484_v12  ;;  %v297_v25 = vsel %vm215_vm7, %v295_v21, %v288_v16  ;;  %v296_v28 = vsel %vm214_vm9, %v294_v20, %v289_v24  ;;  %v282_v29 = vpack.c.bf16 %v280_v27, %v280_v27  ;;  %v689_v44 = vsel %vm327_vm1, %v300_v41, 0 }
 0x11c   : > { %501 = vmatpush1.bf16.msra.mxu1 %v481_v22  ;;  %553 = vmatpush1.bf16.msra.mxu0 %v533_v17  ;;  %v299_v26 = vpack.c.bf16 %v297_v25, %v297_v25  ;;  %v298_v31 = vpack.c.bf16 %v296_v28, %v296_v28  ;;  %v303_v35 = vsel %vm217_vm8, %v288_v16, %v295_v21 }
 0x11d   : > { %1501 = vmatprep.subr.msk.bf16.mxu1 %vm327_vm1, %v283_v23  ;;  %518 = vmatprep.mubr.bf16.mxu1 %v1736_v6  ;;  %v585_v36 = vsel %vm327_vm1, %v282_v29, 0  ;;  %v305_v39 = vpack.c.bf16 %v303_v35, %v303_v35  ;;  %v302_v40 = vsel %vm216_vm10, %v289_v24, %v294_v20 }
 0x11e   : > { %1503 = vmatprep.subr.msk.bf16.mxu0 %vm327_vm1, %v299_v26  ;;  %570 = vmatprep.mubr.bf16.mxu0 %v1736_v6  ;;  %v637_v37 = vsel %vm327_vm1, %v298_v31, 0  ;;  %v304_v42 = vpack.c.bf16 %v302_v40, %v302_v40 }
 0x120   : > { %v741_v45 = vsel %vm327_vm1, %v304_v42, 0 }
 0x123   : > { %1498 = vmatmul.mubr.msk.bf16.vlgmr.msra.gmra.mxu1 %vm323_vm4, %v1485_v33  ;;  %1500 = vmatmul.mubr.msk.bf16.vlgmr.msra.gmra.mxu0 %vm323_vm4, %v1486_v34 }
 0x124   : > { %605 = vmatpush1.bf16.msra.mxu1 %v585_v36  ;;  %657 = vmatpush1.bf16.msra.mxu0 %v637_v37 }
 0x125   : > { %1505 = vmatprep.subr.msk.bf16.mxu1 %vm327_vm1, %v301_v38  ;;  %1507 = vmatprep.subr.msk.bf16.mxu0 %vm327_vm1, %v305_v39 }
 0x126   : > { %622 = vmatprep.mubr.bf16.mxu1 %v1736_v6  ;;  %674 = vmatprep.mubr.bf16.mxu0 %v1736_v6 }
 0x12b   : > { %1502 = vmatmul.mubr.msk.bf16.vlgmr.msra.gmra.mxu1 %vm323_vm4, %v1487_v19  ;;  %1504 = vmatmul.mubr.msk.bf16.vlgmr.msra.gmra.mxu0 %vm323_vm4, %v1488_v43 }
 0x12c   : > { %709 = vmatpush1.bf16.msra.mxu1 %v689_v44  ;;  %761 = vmatpush1.bf16.msra.mxu0 %v741_v45 }
 0x12d   : > { %726 = vmatprep.mubr.bf16.mxu1 %v1736_v6  ;;  %778 = vmatprep.mubr.bf16.mxu0 %v1736_v6 }
 0x133   : > { %1506 = vmatmul.mubr.msk.bf16.vlgmr.msra.gmra.mxu1 %vm323_vm4, %v1489_v15  ;;  %1508 = vmatmul.mubr.msk.bf16.vlgmr.msra.gmra.mxu0 %vm323_vm4, %v1490_v46 }
 0x134   : > { %953 = vmatprep.mubr.bf16.mxu1 %v1736_v6  ;;  %1003 = vmatprep.mubr.bf16.mxu0 %v1736_v6 }
 0x15d   : > { %v368_v47 = vpop.f32.mrf.mxu0 }
 0x15f   : > { %v370_v48 = vpop.f32.mrf.mxu0 }
 0x161   : > { %v372_v49 = vpop.f32.mrf.mxu0 }
 0x163   : > { %v373_v50 = vpop.f32.mrf.mxu0 }
 0x1db   : > { %v418_v51 = vpop.f32.mrf.mxu1  ;;  %v468_v52 = vpop.f32.mrf.mxu0 }
 0x1dc   : > { %v419_v59 = vadd.f32 %v418_v51, %v368_v47 }
 0x1dd   : > { %v420_v53 = vpop.f32.mrf.mxu1  ;;  %v470_v54 = vpop.f32.mrf.mxu0 }
 0x1de   : > { %v421_v62 = vadd.f32 %v420_v53, %v370_v48  ;;  %v475_v2 = vadd.f32 %v468_v52, %v419_v59 }
 0x1df   : > { %v422_v55 = vpop.f32.mrf.mxu1  ;;  %v472_v56 = vpop.f32.mrf.mxu0 }
 0x1e0   : > { %v476_v7 = vadd.f32 %v470_v54, %v421_v62 }
 0x1e1   : > { %v423_v57 = vpop.f32.mrf.mxu1  ;;  %v473_v58 = vpop.f32.mrf.mxu0 }
 0x1e3   : > { %v520_v60 = vpop.f32.mrf.mxu1  ;;  %v572_v61 = vpop.f32.mrf.mxu0 }
 0x1e4   : > { %v527_v8 = vadd.f32 %v520_v60, %v475_v2 }
 0x1e5   : > { %v522_v63 = vpop.f32.mrf.mxu1  ;;  %v574_v1 = vpop.f32.mrf.mxu0 }
 0x1e6   : > { %v528_v12 = vadd.f32 %v522_v63, %v476_v7  ;;  %v579_v16 = vadd.f32 %v572_v61, %v527_v8 }
 0x1e7   : > { %v524_v3 = vpop.f32.mrf.mxu1  ;;  %v576_v5 = vpop.f32.mrf.mxu0 }
 0x1e8   : > { %v580_v20 = vadd.f32 %v574_v1, %v528_v12 }
 0x1e9   : > { %v525_v10 = vpop.f32.mrf.mxu1  ;;  %v577_v11 = vpop.f32.mrf.mxu0 }
 0x1eb   : > { %v624_v13 = vpop.f32.mrf.mxu1  ;;  %v676_v14 = vpop.f32.mrf.mxu0 }
 0x1ec   : > { %v631_v21 = vadd.f32 %v624_v13, %v579_v16 }
 0x1ed   : > { %v626_v17 = vpop.f32.mrf.mxu1  ;;  %v678_v18 = vpop.f32.mrf.mxu0 }
 0x1ee   : > { %v632_v24 = vadd.f32 %v626_v17, %v580_v20  ;;  %v683_v27 = vadd.f32 %v676_v14, %v631_v21 }
 0x1ef   : > { %v628_v22 = vpop.f32.mrf.mxu1  ;;  %v680_v23 = vpop.f32.mrf.mxu0 }
 0x1f0   : > { %v684_v31 = vadd.f32 %v678_v18, %v632_v24  ;;  %v1509_v18 = vld [vmem:[%s2189_s2 + $0x2] sm:$0x3] }
 0x1f1   : > { %v629_v25 = vpop.f32.mrf.mxu1  ;;  %v681_v26 = vpop.f32.mrf.mxu0 }
 0x1f3   : > { %v728_v28 = vpop.f32.mrf.mxu1  ;;  %v780_v29 = vpop.f32.mrf.mxu0 }
 0x1f4   : > { %v735_v33 = vadd.f32 %v728_v28, %v683_v27 }
 0x1f5   : > { %v730_v34 = vpop.f32.mrf.mxu1  ;;  %v782_v35 = vpop.f32.mrf.mxu0 }
 0x1f6   : > { %v787_v36 = vadd.f32 %v780_v29, %v735_v33  ;;  %v736_v37 = vadd.f32 %v730_v34, %v684_v31 }
 0x1f7   : > { %v732_v38 = vpop.f32.mrf.mxu1  ;;  %v784_v39 = vpop.f32.mrf.mxu0 }
 0x1f8   : > { %v788_v40 = vadd.f32 %v782_v35, %v736_v37  ;;  %v790_v19 = vsel %vm789_vm11, %v787_v36, 0.0 }
 0x1f9   : > { %v733_v41 = vpop.f32.mrf.mxu1  ;;  %v785_v42 = vpop.f32.mrf.mxu0 }
 0x1fa   : > { %v791_v43 = vsel %vm789_vm11, %v788_v40, 0.0 }
 0x1fb   : > { %v792_v44 = vadd.f32 %v791_v43, %v790_v19 }
 0x1fd   : > { %793 = vadd.xlane.f32.xlu0 %v792_v44 }
 0x286   : > { %v794_v45 = vpop.xlane.xlu0 %793 }
 0x287   : > { %v796_v15 = vmul.f32 0.00390625, %v794_v45 }
 0x289   : > { %v797_v46 = vsub.f32 %v787_v36, %v796_v15  ;;  %v798_v47 = vsub.f32 %v788_v40, %v796_v15 }
 0x28b   : > { %v799_v48 = vmul.f32 %v797_v46, %v797_v46  ;;  %v800_v49 = vmul.f32 %v798_v47, %v798_v47 }
 0x28d   : > { %v801_v50 = vsel %vm789_vm11, %v799_v48, 0.0  ;;  %v802_v51 = vsel %vm789_vm11, %v800_v49, 0.0 }
 0x28e   : > { %v803_v52 = vadd.f32 %v802_v51, %v801_v50 }
 0x290   : > { %804 = vadd.xlane.f32.xlu1 %v803_v52 }
 0x319   : > { %v805_v53 = vpop.xlane.xlu1 %804 }
 0x31a   : > { %v806_v54 = vmul.f32 0.00390625, %v805_v53 }
 0x31c   : > { %v807_v55 = vadd.f32 1e-05, %v806_v54 }
 0x31e   : > { %1667 = vrsqrt.f32 %v807_v55 }
 0x32b   : > { %v1668_v56 = vpop.eup %1667 }
 0x32c   : > { %v809_v57 = vmul.f32 %v1668_v56, %v797_v46  ;;  %v810_v58 = vmul.f32 %v1668_v56, %v798_v47 }
 0x32e   : > { %v1998_v59 = vmax.f32 %v809_v57, 0.0  ;;  %v2000_v60 = vmax.f32 %v810_v58, 0.0 }
 0x330   : > { %v1631_v61 = vpack.i.bf16 %v2000_v60, %v1998_v59  ;;  %v868_v27 = vpack.c.bf16 %v2000_v60, %v2000_v60  ;;  %v867_v28 = vpack.c.bf16 %v1998_v59, %v1998_v59 }
 0x332   : > { %1632 = vrot.lane.b32.xlu1 %v1631_v61, %s1734_s7  ;;  %1627 = vrot.lane.b32.xlu0 %v1631_v61, %s1733_s6  ;;  %s188_s7 = sand.u32 1, %s1723_s16  }
 0x333   : > { %s1403_s5 = scalar_lea.sflag [#allocation3], %s188_s7 }
 0x3a4   : > { %v1633_v62 = vpop.permute.xlu1 %1632  ;;  %v1628_v63 = vpop.permute.xlu0 %1627 }
 0x3a5   : > { %v1635_v1 = vunpack.i.h.bf16 %v1633_v62  ;;  %v1634_v2 = vunpack.i.l.bf16 %v1633_v62  ;;  %v1630_v3 = vunpack.i.h.bf16 %v1628_v63  ;;  %v1629_v5 = vunpack.i.l.bf16 %v1628_v63  ;;  %v1510_v62 = vld [vmem:[%s2189_s2 + $0x4] sm:$0x3] }
 0x3a7   : > { %v2008_v7 = vsel %vm231_vm2, %v1634_v2, %v1635_v1  ;;  %v817_v8 = vsel %vm210_vm0, %v1629_v5, %v1630_v3  ;;  %v818_v10 = vsel %vm210_vm0, %v1630_v3, %v1629_v5  ;;  %v824_v16 = vsel %vm231_vm2, %v1635_v1, %v1634_v2 }
 0x3a8   : > { %v846_v11 = vpack.c.bf16 %v817_v8, %v817_v8  ;;  %v825_v12 = vsel %vm210_vm0, %v2008_v7, %v818_v10  ;;  %v2028_v20 = vsel %vm213_vm3, %v817_v8, %v824_v16  ;;  %v889_v30 = vpack.c.bf16 %v2008_v7, %v2008_v7 }
 0x3a9   : > { %v1641_v13 = vpack.i.bf16 %v817_v8, %v825_v12  ;;  %v845_v14 = vpack.c.bf16 %v825_v12, %v825_v12  ;;  %v1661_v21 = vpack.i.bf16 %v2028_v20, %v2008_v7  ;;  %v1120_v12 = vsel %vm327_vm1, %v867_v28, 0  ;;  %v1515_v7 = vld [vmem:[%s2189_s2 + $0xe] sm:$0x3] }
 0x3aa   : > { %1517 = vmatprep.subr.msk.bf16.mxu1 %vm327_vm1, %v846_v11 }
 0x3ab   : > { %1642 = vrot.lane.b32.xlu1 %v1641_v13, %s1737_s11  ;;  %1637 = vrot.lane.b32.xlu0 %v1641_v13, %s1735_s8  ;;  %v916_v17 = vsel %vm327_vm1, %v845_v14, 0 }
 0x3ac   : > { %936 = vmatpush1.bf16.msra.mxu1 %v916_v17 }
 0x3af   : > { %1652 = vrot.lane.b32.xlu1 %v1631_v61, %s1737_s11  ;;  %1647 = vrot.lane.b32.xlu0 %v1631_v61, %s1735_s8  ;;  %v895_v61 = vld [vmem:[%s2189_s2] sm:$0x3] }
 0x3b0   : > { %1518 = vmatmul.mubr.msk.bf16.vlgmr.msra.gmra.mxu1 %vm323_vm4, %v1509_v18 }
 0x3b1   : > { %1053 = vmatprep.mubr.bf16.mxu1 %v1736_v6 }
 0x3b3   : > { %1662 = vrot.lane.b32.xlu1 %v1661_v21, %s1737_s11  ;;  %1657 = vrot.lane.b32.xlu0 %v1661_v21, %s1735_s8  ;;  %s1480_s8 = sshll.u32 %s188_s7, 3  ;;  %s1541_s11 = sshll.u32 %s1785_s19, 7 }
 0x3b4   : > { %s190_s23 = scalar_lea.vmem [#allocation2], %s1480_s8  ;;  %s1415_s30 = scalar_lea.hbm %s2191_s4, %s1541_s11 }
 0x3b5   : > { %s1417_s27 = sshll.u32 %s190_s23, 4  ;;  %s1677_s19 = scalar_lea.vmem %s1676_s12, 256  ;;  %s1418_s27 = int_to_ptr.vmem [resolvable:$true] %s1417_s27 }
 0x3b6   : > { %s1671_s9 = scalar_lea.vmem %s1418_s27, 128  ;;  %p1678_p0 = scmp.lt.s32.totalorder %s1418_s27, %s1676_s12 }
 0x3b7   : > { %p1672_p11 = scmp.ne.s32.totalorder %s1418_s27, %s1671_s9  ;;  %p1679_p1 = scmp.lt.s32.totalorder %s1677_s19, %s1671_s9 }
 0x3b9   : > { %p1673_p12 = pnand %p1672_p11, %p1802_p5  ;;  %p1680_p2 = por %p1679_p1, %p1678_p0 }
 0x3bb   : > { %p1674_p13 = pneg %p1673_p12 }
 0x3bd   : > { %p1681_p3 = pnand %p1680_p2, %p1674_p13 }
 0x41d   : > { %v1643_v22 = vpop.permute.xlu1 %1642  ;;  %v1638_v23 = vpop.permute.xlu0 %1637 }
 0x41e   : > { %v1645_v9 = vunpack.i.h.bf16 %v1643_v22  ;;  %v1644_v24 = vunpack.i.l.bf16 %v1643_v22  ;;  %v1640_v25 = vunpack.i.h.bf16 %v1638_v23  ;;  %v1639_v26 = vunpack.i.l.bf16 %v1638_v23  ;;  %v1511_v22 = vld [vmem:[%s2189_s2 + $0x6] sm:$0x3]  ;;  %v1512_v23 = vld [vmem:[%s2189_s2 + $0x8] sm:$0x3] }
 0x420   : > { %v839_v29 = vsel %vm249_vm6, %v1644_v24, %v1645_v9  ;;  %v840_v31 = vsel %vm249_vm6, %v1645_v9, %v1644_v24  ;;  %v833_v33 = vsel %vm242_vm5, %v1639_v26, %v1640_v25  ;;  %v834_v34 = vsel %vm242_vm5, %v1640_v25, %v1639_v26 }
 0x421   : > { %v1653_v35 = vpop.permute.xlu1 %1652  ;;  %v1648_v36 = vpop.permute.xlu0 %1647  ;;  %v842_v37 = vsel %vm215_vm7, %v840_v31, %v833_v33  ;;  %v848_v38 = vsel %vm217_vm8, %v833_v33, %v840_v31  ;;  %v841_v39 = vsel %vm214_vm9, %v839_v29, %v834_v34  ;;  %v847_v40 = vsel %vm216_vm10, %v834_v34, %v839_v29  ;;  %v1516_v34 = vld [vmem:[%s2189_s2 + $0x10] sm:$0x3] }
 0x422   : > { %v1655_v41 = vunpack.i.h.bf16 %v1653_v35  ;;  %v1654_v42 = vunpack.i.l.bf16 %v1653_v35  ;;  %v1650_v19 = vunpack.i.h.bf16 %v1648_v36  ;;  %v1649_v43 = vunpack.i.l.bf16 %v1648_v36 }
 0x423   : > { %v844_v44 = vpack.c.bf16 %v842_v37, %v842_v37  ;;  %v850_v45 = vpack.c.bf16 %v848_v38, %v848_v38  ;;  %v843_v15 = vpack.c.bf16 %v841_v39, %v841_v39  ;;  %v849_v46 = vpack.c.bf16 %v847_v40, %v847_v40 }
 0x424   : > { %v861_v47 = vsel %vm249_vm6, %v1654_v42, %v1655_v41  ;;  %v862_v48 = vsel %vm249_vm6, %v1655_v41, %v1654_v42  ;;  %v855_v49 = vsel %vm242_vm5, %v1649_v43, %v1650_v19  ;;  %v856_v50 = vsel %vm242_vm5, %v1650_v19, %v1649_v43 }
 0x425   : > { %1519 = vmatprep.subr.msk.bf16.mxu0 %vm327_vm1, %v844_v44  ;;  %1521 = vmatprep.subr.msk.bf16.mxu1 %vm327_vm1, %v850_v45  ;;  %v966_v51 = vsel %vm327_vm1, %v843_v15, 0  ;;  %v1016_v52 = vsel %vm327_vm1, %v849_v46, 0  ;;  %v1663_v53 = vpop.permute.xlu1 %1662  ;;  %v1658_v54 = vpop.permute.xlu0 %1657  ;;  %v864_v55 = vsel %vm215_vm7, %v862_v48, %v855_v49  ;;  %v863_v56 = vsel %vm214_vm9, %v861_v47, %v856_v50 }
 0x426   : > { %986 = vmatpush1.bf16.msra.mxu0 %v966_v51  ;;  %1036 = vmatpush1.bf16.msra.mxu1 %v1016_v52  ;;  %v1665_v57 = vunpack.i.h.bf16 %v1663_v53  ;;  %v1664_v58 = vunpack.i.l.bf16 %v1663_v53  ;;  %v1660_v59 = vunpack.i.h.bf16 %v1658_v54  ;;  %v1659_v60 = vunpack.i.l.bf16 %v1658_v54 }
 0x427   : > { %1525 = vmatprep.subr.msk.bf16.mxu1 %vm327_vm1, %v868_v27  ;;  %v866_v63 = vpack.c.bf16 %v864_v55, %v864_v55  ;;  %v865_v1 = vpack.c.bf16 %v863_v56, %v863_v56  ;;  %v870_v2 = vsel %vm217_vm8, %v855_v49, %v862_v48  ;;  %v869_v14 = vsel %vm216_vm10, %v856_v50, %v861_v47 }
 0x428   : > { %v883_v3 = vsel %vm249_vm6, %v1664_v58, %v1665_v57  ;;  %v884_v5 = vsel %vm249_vm6, %v1665_v57, %v1664_v58  ;;  %v877_v8 = vsel %vm242_vm5, %v1659_v60, %v1660_v59  ;;  %v878_v10 = vsel %vm242_vm5, %v1660_v59, %v1659_v60 }
 0x429   : > { %1520 = vmatmul.mubr.msk.bf16.vlgmr.msra.gmra.mxu0 %vm323_vm4, %v895_v61  ;;  %1522 = vmatmul.mubr.msk.bf16.vlgmr.msra.gmra.mxu1 %vm323_vm4, %v1510_v62  ;;  %v1068_v11 = vsel %vm327_vm1, %v865_v1, 0  ;;  %v886_v13 = vsel %vm215_vm7, %v884_v5, %v877_v8  ;;  %v872_v16 = vpack.c.bf16 %v870_v2, %v870_v2  ;;  %v885_v17 = vsel %vm214_vm9, %v883_v3, %v878_v10 }
 0x42a   : > { %1523 = vmatprep.subr.msk.bf16.mxu0 %vm327_vm1, %v866_v63  ;;  %1140 = vmatpush1.bf16.msra.mxu1 %v1120_v12  ;;  %v888_v4 = vpack.c.bf16 %v886_v13, %v886_v13  ;;  %v871_v18 = vpack.c.bf16 %v869_v14, %v869_v14  ;;  %v887_v21 = vpack.c.bf16 %v885_v17, %v885_v17  ;;  %v1276_v31 = vsel %vm327_vm1, %v889_v30, 0 }
 0x42b   : > { %1088 = vmatpush1.bf16.msra.mxu0 %v1068_v11  ;;  %1105 = vmatprep.mubr.bf16.mxu0 %v1736_v6  ;;  %v892_v9 = vsel %vm217_vm8, %v877_v8, %v884_v5  ;;  %v890_v26 = vpack.c.bf16 %v2028_v20, %v2028_v20  ;;  %v891_v28 = vsel %vm216_vm10, %v878_v10, %v883_v3  ;;  %v1513_v20 = vld [vmem:[%s2189_s2 + $0xa] sm:$0x3] }
 0x42c   : > { %1527 = vmatprep.subr.msk.bf16.mxu0 %vm327_vm1, %v872_v16  ;;  %1529 = vmatprep.subr.msk.bf16.mxu1 %vm327_vm1, %v888_v4  ;;  %v1172_v24 = vsel %vm327_vm1, %v871_v18, 0  ;;  %v1224_v25 = vsel %vm327_vm1, %v887_v21, 0  ;;  %v894_v27 = vpack.c.bf16 %v892_v9, %v892_v9  ;;  %v893_v29 = vpack.c.bf16 %v891_v28, %v891_v28 }
 0x42d   : > { %1157 = vmatprep.mubr.bf16.mxu1 %v1736_v6 }
 0x42e   : > { %v1328_v33 = vsel %vm327_vm1, %v893_v29, 0 }
 0x431   : > { %1524 = vmatmul.mubr.msk.bf16.vlgmr.msra.gmra.mxu0 %vm323_vm4, %v1511_v22  ;;  %1526 = vmatmul.mubr.msk.bf16.vlgmr.msra.gmra.mxu1 %vm323_vm4, %v1512_v23 }
 0x432   : > { %1192 = vmatpush1.bf16.msra.mxu0 %v1172_v24  ;;  %1244 = vmatpush1.bf16.msra.mxu1 %v1224_v25 }
 0x433   : > { %1531 = vmatprep.subr.msk.bf16.mxu0 %vm327_vm1, %v890_v26  ;;  %1533 = vmatprep.subr.msk.bf16.mxu1 %vm327_vm1, %v894_v27 }
 0x434   : > { %1209 = vmatprep.mubr.bf16.mxu0 %v1736_v6  ;;  %1261 = vmatprep.mubr.bf16.mxu1 %v1736_v6 }
 0x439   : > { %1528 = vmatmul.mubr.msk.bf16.vlgmr.msra.gmra.mxu0 %vm323_vm4, %v1513_v20  ;;  %1530 = vmatmul.mubr.msk.bf16.vlgmr.msra.gmra.mxu1 %vm323_vm4, %v1514_v32 }
 0x43a   : > { %1296 = vmatpush1.bf16.msra.mxu0 %v1276_v31  ;;  %1348 = vmatpush1.bf16.msra.mxu1 %v1328_v33 }
 0x43b   : > { %1313 = vmatprep.mubr.bf16.mxu0 %v1736_v6  ;;  %1365 = vmatprep.mubr.bf16.mxu1 %v1736_v6 }
 0x441   : > { %1532 = vmatmul.mubr.msk.bf16.vlgmr.msra.gmra.mxu0 %vm323_vm4, %v1515_v7  ;;  %1534 = vmatmul.mubr.msk.bf16.vlgmr.msra.gmra.mxu1 %vm323_vm4, %v1516_v34 }
 0x470   : > { %v955_v35 = vpop.f32.mrf.mxu1 }
 0x472   : > { %v957_v36 = vpop.f32.mrf.mxu1 }
 0x474   : > { %v959_v37 = vpop.f32.mrf.mxu1 }
 0x476   : > { %v960_v38 = vpop.f32.mrf.mxu1 }
 0x4e9   : > { %v1005_v39 = vpop.f32.mrf.mxu0  ;;  %v1055_v40 = vpop.f32.mrf.mxu1 }
 0x4ea   : > { %v1006_v45 = vadd.f32 %v1005_v39, %v955_v35 }
 0x4eb   : > { %v1007_v41 = vpop.f32.mrf.mxu0  ;;  %v1057_v6 = vpop.f32.mrf.mxu1 }
 0x4ec   : > { %v1008_v47 = vadd.f32 %v1007_v41, %v957_v36  ;;  %v1062_v50 = vadd.f32 %v1055_v40, %v1006_v45 }
 0x4ed   : > { %v1009_v42 = vpop.f32.mrf.mxu0  ;;  %v1059_v19 = vpop.f32.mrf.mxu1 }
 0x4ee   : > { %v1063_v53 = vadd.f32 %v1057_v6, %v1008_v47 }
 0x4ef   : > { %v1010_v43 = vpop.f32.mrf.mxu0  ;;  %v1060_v44 = vpop.f32.mrf.mxu1 }
 0x4f1   : > { %v1107_v15 = vpop.f32.mrf.mxu0  ;;  %v1159_v46 = vpop.f32.mrf.mxu1 }
 0x4f2   : > { %v1114_v54 = vadd.f32 %v1107_v15, %v1062_v50 }
 0x4f3   : > { %v1109_v48 = vpop.f32.mrf.mxu0  ;;  %v1161_v49 = vpop.f32.mrf.mxu1 }
 0x4f4   : > { %v1115_v57 = vadd.f32 %v1109_v48, %v1063_v53  ;;  %v1166_v60 = vadd.f32 %v1159_v46, %v1114_v54 }
 0x4f5   : > { %v1111_v51 = vpop.f32.mrf.mxu0  ;;  %v1163_v52 = vpop.f32.mrf.mxu1 }
 0x4f6   : > { %v1167_v63 = vadd.f32 %v1161_v49, %v1115_v57 }
 0x4f7   : > { %v1112_v55 = vpop.f32.mrf.mxu0  ;;  %v1164_v56 = vpop.f32.mrf.mxu1 }
 0x4f9   : > { %v1211_v58 = vpop.f32.mrf.mxu0  ;;  %v1263_v59 = vpop.f32.mrf.mxu1 }
 0x4fa   : > { %v1218_v1 = vadd.f32 %v1211_v58, %v1166_v60 }
 0x4fb   : > { %v1213_v61 = vpop.f32.mrf.mxu0  ;;  %v1265_v62 = vpop.f32.mrf.mxu1 }
 0x4fc   : > { %v1219_v5 = vadd.f32 %v1213_v61, %v1167_v63  ;;  %v1270_v11 = vadd.f32 %v1263_v59, %v1218_v1 }
 0x4fd   : > { %v1215_v2 = vpop.f32.mrf.mxu0  ;;  %v1267_v3 = vpop.f32.mrf.mxu1 }
 0x4fe   : > { %v1271_v14 = vadd.f32 %v1265_v62, %v1219_v5 }
 0x4ff   : > { %v1216_v8 = vpop.f32.mrf.mxu0  ;;  %v1268_v10 = vpop.f32.mrf.mxu1 }
 0x501   : > { %v1315_v12 = vpop.f32.mrf.mxu0  ;;  %v1367_v13 = vpop.f32.mrf.mxu1 }
 0x502   : > { %v1322_v16 = vadd.f32 %v1315_v12, %v1270_v11 }
 0x503   : > { %v1317_v4 = vpop.f32.mrf.mxu0  ;;  %v1369_v17 = vpop.f32.mrf.mxu1 }
 0x504   : > { %v1374_v18 = vadd.f32 %v1367_v13, %v1322_v16  ;;  %v1323_v21 = vadd.f32 %v1317_v4, %v1271_v14 }
 0x505   : > { %v1319_v22 = vpop.f32.mrf.mxu0  ;;  %v1371_v23 = vpop.f32.mrf.mxu1 }
 0x506   : > { %v1375_v9 = vadd.f32 %v1369_v17, %v1323_v21  ;;  %v1376_v26 = vsel %vm789_vm11, %v1374_v18, 0.0 }
 0x507   : > { %v1320_v24 = vpop.f32.mrf.mxu0  ;;  %v1372_v25 = vpop.f32.mrf.mxu1 }
 0x508   : > { %v1377_v27 = vsel %vm789_vm11, %v1375_v9, 0.0 }
 0x509   : > { %v1378_v28 = vadd.f32 %v1377_v27, %v1376_v26 }
 0x50b   : > { %1379 = vadd.xlane.f32.xlu0 %v1378_v28 }
 0x594   : > { %v1380_v30 = vpop.xlane.xlu0 %1379 }
 0x595   : > { %v1381_v29 = vmul.f32 0.00390625, %v1380_v30 }
 0x597   : > { %v1382_v20 = vsub.f32 %v1374_v18, %v1381_v29  ;;  %v1383_v32 = vsub.f32 %v1375_v9, %v1381_v29 }
 0x599   : > { %v1384_v31 = vmul.f32 %v1382_v20, %v1382_v20  ;;  %v1385_v33 = vmul.f32 %v1383_v32, %v1383_v32 }
 0x59b   : > { %v1386_v7 = vsel %vm789_vm11, %v1384_v31, 0.0  ;;  %v1387_v34 = vsel %vm789_vm11, %v1385_v33, 0.0 }
 0x59c   : > { %v1388_v35 = vadd.f32 %v1387_v34, %v1386_v7 }
 0x59e   : > { %1389 = vadd.xlane.f32.xlu1 %v1388_v35 }
 0x627   : > { %v1390_v36 = vpop.xlane.xlu1 %1389 }
 0x628   : > { %v1391_v37 = vmul.f32 0.00390625, %v1390_v36 }
 0x62a   : > { %v1392_v38 = vadd.f32 1e-05, %v1391_v37 }
 0x62c   : > { %1669 = vrsqrt.f32 %v1392_v38 }
 0x639   : > { %v1670_v39 = vpop.eup %1669 }
 0x63a   : > { %v1394_v40 = vmul.f32 %v1670_v39, %v1382_v20  ;;  %v1395_v41 = vmul.f32 %v1670_v39, %v1383_v32 }
 0x63c   : > { %v1398_v6 = vcombine.low %v1394_v40, %v1395_v41 }
 0x63e   : > { %v1400_v42 = vadd.f32 %v1398_v6, %v1817_v0 }
 0x640   : > { %1401 = vst [vmem:[%s190_s23] sm:$0xff] %v1400_v42 }
 0x641   : > { %1684 = shalt.err (!%p1681_p3)
}
 0x642   : > { %s1685_s13 = scalar_lea.hbm %s1415_s30, 128  ;;  %s1689_s22 = scalar_lea.hbm %s2191_s4, 256 }
 0x643   : > { %p1686_p4 = scmp.ne.s32.totalorder %s1415_s30, %s1685_s13  ;;  %p1690_p9 = scmp.lt.s32.totalorder %s1415_s30, %s2191_s4 }
 0x644   : > { %p1691_p10 = scmp.lt.s32.totalorder %s1689_s22, %s1685_s13 }
 0x645   : > { %p1687_p7 = pnand %p1686_p4, %p1802_p5 }
 0x646   : > { %p1692_p11 = por %p1691_p10, %p1690_p9 }
 0x647   : > { %p1688_p8 = pneg %p1687_p7 }
 0x649   : > { %p1693_p12 = pnand %p1692_p11, %p1688_p8 }
 0x64b   : > { %1696 = shalt.err (!%p1693_p12)
}
 0x64c   : > { %1542 = dma.vmem_to_hbm [thread:$0]  (%p1802_p5), %s1418_s27, 128, %s1415_s30, %s1403_s5  }
 0x64d PF: > { %p1548_p13 = scmp.ge.s32.totalorder %s1731_s18, 2  ;;  %s1429_s8 = sand.u32 1, %s1719_s15  }
 0x64e   : > { %s1430_s11 = scalar_lea.sflag [#allocation3], %s1429_s8 }
 0x64f   : > { %p1545_p0 = pnand %p1548_p13, %p1806_p6 }
 0x651   : > { %p1546_p1 = pneg %p1545_p0 }
 0x653   : > { %1714 = dma.done.wait (%p1546_p1), %s1430_s11, 128  }
 0x654   : > { %1716 = vsyncadd (%p1546_p1), %s1430_s11, 4294967168  ;;  %p14_p2 = scmp.ge.s32.totalorder %s1789_s21, 4   ;;  %s2194_s15 = smov %s1723_s16 }
 0x655   : > { %s2195_s16 = smov %s1727_s17  ;;  %s2196_s17 = smov %s1800_s24 }
 0x656   : > { %s2197_s18 = smov %s1789_s21  ;;  %16 = sbr.rel (!%p14_p2) target bundleno = 3 (0x3), region = 87 }
 0x65b   :  { %1435 = vsyncpa [#allocation3], 1 }
 0x65c   :  { %1437 = vsyncpa [#allocation3 + $0x1], 1 }

</bundles_post_ra>
